<compile_context>
chip_gen: v6e
topology: v6e:2x2x1
jax: 0.10.0
libtpu: 0.0.40
codegen_flags: <defaults>
</compile_context>

<pallas_src>
import functools

import jax
import jax.numpy as jnp
from jax.experimental import pallas as pl
from jax.experimental.pallas import tpu as pltpu

D_IN, D_H1, D_H2, D_OUT = 400, 256, 128, 4


def _cdiv(a, b):
    return (a + b - 1) // b


def _round_up(n, m):
    return _cdiv(n, m) * m


def mlp_kernel(x_ref, w1_ref, b1_ref, w2_ref, b2_ref, w3_ref, b3_ref, o_ref):
    """Fused relu(x@W1+b1) -> relu(.@W2+b2) -> .@W3+b3 on one batch tile.

    x arrives as f32 and is cast to bf16 in-kernel (VPU is idle); weights are
    bf16; all matmuls accumulate in f32 on the MXU; biases/output are f32.
    """
    x = x_ref[...].astype(jnp.bfloat16)                      # (tb, 400)

    h1 = jnp.dot(x, w1_ref[...], preferred_element_type=jnp.float32) + b1_ref[...]
    h1 = jnp.maximum(h1, 0.0).astype(jnp.bfloat16)
    # TODO(synk): dropout(p=0.5) is identity here (eval mode); training-mode
    # masking would use pltpu.prng_seed + pltpu.prng_random_bits.

    h2 = jnp.dot(h1, w2_ref[...], preferred_element_type=jnp.float32) + b2_ref[...]
    h2 = jnp.maximum(h2, 0.0).astype(jnp.bfloat16)

    o_ref[...] = (
        jnp.dot(h2, w3_ref[...], preferred_element_type=jnp.float32) + b3_ref[...]
    )


def _choose_tile(B, tile_b):
    """Pick (tb, Bp): tile rows (multiple of 8) and padded batch."""
    B8 = _round_up(max(B, 1), 8)
    if B8 <= 8:
        return B8, B8
    # >= 2 grid steps so both v7x TensorCores get work; cap the tile at
    # tile_b; size tb near ceil(B/steps) so row padding is at most 7 rows.
    n_steps = max(2, _cdiv(B8, tile_b))
    tb = _round_up(_cdiv(B8, n_steps), 8)
    Bp = _round_up(B8, tb)
    return tb, Bp


@functools.partial(jax.jit, static_argnames=("tile_b",))
def mlp_forward(x, params, *, tile_b=4096):
    """x: (B, 400) float32 -> (B, 4) float32."""
    w1, b1, w2, b2, w3, b3 = params
    B = x.shape[0]
    tb, Bp = _choose_tile(B, tile_b)

    # x stays f32 and unpadded along features; only pad rows up to Bp.
    x_in = x if Bp == B else jnp.pad(x, ((0, Bp - B), (0, 0)))

    # One-time tiny casts (fused by XLA); weights bf16, biases f32.
    w1_c = w1.astype(jnp.bfloat16)
    w2_c = w2.astype(jnp.bfloat16)
    w3_c = w3.astype(jnp.bfloat16)
    b1_c = b1.astype(jnp.float32)
    b2_c = b2.astype(jnp.float32)
    b3_c = b3.astype(jnp.float32)

    const = lambda i: (0, 0)   # weights/biases: same block every grid step

    out = pl.pallas_call(
        mlp_kernel,
        out_shape=jax.ShapeDtypeStruct((Bp, D_OUT), jnp.float32),
        grid=(Bp // tb,),
        in_specs=[
            pl.BlockSpec((tb, D_IN), lambda i: (i, 0)),   # x (streamed, f32)
            pl.BlockSpec((D_IN, D_H1), const),            # W1 (resident)
            pl.BlockSpec((1, D_H1), const),               # b1
            pl.BlockSpec((D_H1, D_H2), const),            # W2
            pl.BlockSpec((1, D_H2), const),               # b2
            pl.BlockSpec((D_H2, D_OUT), const),           # W3
            pl.BlockSpec((1, D_OUT), const),              # b3
        ],
        out_specs=pl.BlockSpec((tb, D_OUT), lambda i: (i, 0)),
        compiler_params=pltpu.CompilerParams(
            dimension_semantics=("parallel",),
            # ~36 MiB real footprint at tb=4096 (double-buffered f32 x tile,
            # compact out tile, resident weights, f32/bf16 intermediates);
            # 56 MiB stays under v7x's 64 MiB/TC and well under v5e/v6e 128 MiB.
            vmem_limit_bytes=56 * 1024 * 1024,
        ),
    )(x_in, w1_c, b1_c, w2_c, b2_c, w3_c, b3_c)

    return out if Bp == B else out[:B]


def init_params(key):
    """Deterministic parameter init matching nn.Linear shapes.

    PyTorch nn.Linear(in, out) has weight (out, in), bias (out,); we store the
    weight transposed as (in, out) and the bias as (1, out) for broadcasting.
    """
    dims = [(D_IN, D_H1), (D_H1, D_H2), (D_H2, D_OUT)]
    params = []
    for i, (din, dout) in enumerate(dims):
        kw, kb = jax.random.split(jax.random.fold_in(key, i))
        bound = 1.0 / (din ** 0.5)  # same scale as PyTorch's default init
        w = jax.random.uniform(kw, (din, dout), jnp.float32, -bound, bound)
        b = jax.random.uniform(kb, (1, dout), jnp.float32, -bound, bound)
        params += [w, b]
    return tuple(params)


def mlp_reference(x, params):
    w1, b1, w2, b2, w3, b3 = params
    h1 = jnp.maximum(x @ w1 + b1, 0.0)
    h2 = jnp.maximum(h1 @ w2 + b2, 0.0)
    return h2 @ w3 + b3


if __name__ == "__main__":
    key = jax.random.PRNGKey(0)
    params = init_params(key)

    # Small primary check (single tiny tile) + a ragged multi-tile check that
    # exercises the 2-step grid, resident weights and row padding.
    for batch in (8, 2000):
        x = jax.random.normal(
            jax.random.fold_in(key, 100 + batch), (batch, D_IN), jnp.float32
        )
        out = jax.block_until_ready(mlp_forward(x, params))
        ref = mlp_reference(x, params)
        assert out.shape == (batch, D_OUT), out.shape
        # bf16 matmul path with f32 accumulation: loose tolerance vs f32 ref.
        assert jnp.allclose(out, ref, atol=5e-2, rtol=5e-2), (
            f"mismatch vs reference at batch={batch}"
        )

    print("KERNEL_OK")
</pallas_src>

<mosaic_0001>
module attributes {stable_mosaic.version = 11 : i64} {
  func.func @mlp_kernel(%arg0: i32, %arg1: memref<8x400xf32, #tpu.memory_space<vmem>>, %arg2: memref<400x256xbf16, #tpu.memory_space<vmem>>, %arg3: memref<1x256xf32, #tpu.memory_space<vmem>>, %arg4: memref<256x128xbf16, #tpu.memory_space<vmem>>, %arg5: memref<1x128xf32, #tpu.memory_space<vmem>>, %arg6: memref<128x4xbf16, #tpu.memory_space<vmem>>, %arg7: memref<1x4xf32, #tpu.memory_space<vmem>>, %arg8: memref<8x4xf32, #tpu.memory_space<vmem>>) attributes {dimension_semantics = [#tpu.dimension_semantics<parallel>], iteration_bounds = array<i64: 1>, scalar_prefetch = 0 : i64, scratch_operands = 0 : i64, tpu.core_type = #tpu.core_type<tc>, window_params = [{transform_indices = @transform_0, window_bounds = array<i64: 8, 400>}, {pipeline_mode = #tpu.pipeline_mode<synchronous>, transform_indices = @transform_1, window_bounds = array<i64: 400, 256>}, {pipeline_mode = #tpu.pipeline_mode<synchronous>, transform_indices = @transform_2, window_bounds = array<i64: 1, 256>}, {pipeline_mode = #tpu.pipeline_mode<synchronous>, transform_indices = @transform_3, window_bounds = array<i64: 256, 128>}, {pipeline_mode = #tpu.pipeline_mode<synchronous>, transform_indices = @transform_4, window_bounds = array<i64: 1, 128>}, {pipeline_mode = #tpu.pipeline_mode<synchronous>, transform_indices = @transform_5, window_bounds = array<i64: 128, 4>}, {pipeline_mode = #tpu.pipeline_mode<synchronous>, transform_indices = @transform_6, window_bounds = array<i64: 1, 4>}, {transform_indices = @transform_7, window_bounds = array<i64: 8, 4>}]} {
    %c0 = arith.constant 0 : index
    %c0_0 = arith.constant 0 : index
    %0 = vector.load %arg1[%c0, %c0_0] : memref<8x400xf32, #tpu.memory_space<vmem>>, vector<8x400xf32>
    %1 = arith.truncf %0 : vector<8x400xf32> to vector<8x400xbf16>
    %c0_1 = arith.constant 0 : index
    %c0_2 = arith.constant 0 : index
    %2 = vector.load %arg2[%c0_1, %c0_2] : memref<400x256xbf16, #tpu.memory_space<vmem>>, vector<400x256xbf16>
    %cst = arith.constant dense<0.000000e+00> : vector<8x256xf32>
    %3 = tpu.matmul %1, %2, %cst {dimension_numbers = #tpu.dot_dimension_numbers<[1], [0], [0], [1], [0, 0, 1, 1], [], []>} : vector<8x400xbf16>, vector<400x256xbf16>, vector<8x256xf32> -> vector<8x256xf32>
    %c0_3 = arith.constant 0 : index
    %c0_4 = arith.constant 0 : index
    %4 = vector.load %arg3[%c0_3, %c0_4] : memref<1x256xf32, #tpu.memory_space<vmem>>, vector<1x256xf32>
    %5 = vector.broadcast %4 : vector<1x256xf32> to vector<8x256xf32>
    %6 = arith.addf %3, %5 : vector<8x256xf32>
    %cst_5 = arith.constant 0.000000e+00 : f32
    %7 = vector.broadcast %cst_5 : f32 to vector<8x256xf32>
    %8 = arith.maximumf %6, %7 : vector<8x256xf32>
    %9 = arith.truncf %8 : vector<8x256xf32> to vector<8x256xbf16>
    %c0_6 = arith.constant 0 : index
    %c0_7 = arith.constant 0 : index
    %10 = vector.load %arg4[%c0_6, %c0_7] : memref<256x128xbf16, #tpu.memory_space<vmem>>, vector<256x128xbf16>
    %cst_8 = arith.constant dense<0.000000e+00> : vector<8x128xf32>
    %11 = tpu.matmul %9, %10, %cst_8 {dimension_numbers = #tpu.dot_dimension_numbers<[1], [0], [0], [1], [0, 0, 1, 1], [], []>} : vector<8x256xbf16>, vector<256x128xbf16>, vector<8x128xf32> -> vector<8x128xf32>
    %c0_9 = arith.constant 0 : index
    %c0_10 = arith.constant 0 : index
    %12 = vector.load %arg5[%c0_9, %c0_10] : memref<1x128xf32, #tpu.memory_space<vmem>>, vector<1x128xf32>
    %13 = vector.broadcast %12 : vector<1x128xf32> to vector<8x128xf32>
    %14 = arith.addf %11, %13 : vector<8x128xf32>
    %cst_11 = arith.constant 0.000000e+00 : f32
    %15 = vector.broadcast %cst_11 : f32 to vector<8x128xf32>
    %16 = arith.maximumf %14, %15 : vector<8x128xf32>
    %17 = arith.truncf %16 : vector<8x128xf32> to vector<8x128xbf16>
    %c0_12 = arith.constant 0 : index
    %c0_13 = arith.constant 0 : index
    %18 = vector.load %arg6[%c0_12, %c0_13] : memref<128x4xbf16, #tpu.memory_space<vmem>>, vector<128x4xbf16>
    %cst_14 = arith.constant dense<0.000000e+00> : vector<8x4xf32>
    %19 = tpu.matmul %17, %18, %cst_14 {dimension_numbers = #tpu.dot_dimension_numbers<[1], [0], [0], [1], [0, 0, 1, 1], [], []>} : vector<8x128xbf16>, vector<128x4xbf16>, vector<8x4xf32> -> vector<8x4xf32>
    %c0_15 = arith.constant 0 : index
    %c0_16 = arith.constant 0 : index
    %20 = vector.load %arg7[%c0_15, %c0_16] : memref<1x4xf32, #tpu.memory_space<vmem>>, vector<1x4xf32>
    %21 = vector.broadcast %20 : vector<1x4xf32> to vector<8x4xf32>
    %22 = arith.addf %19, %21 : vector<8x4xf32>
    %c0_17 = arith.constant 0 : index
    %c0_18 = arith.constant 0 : index
    %23 = vector.load %arg8[%c0_17, %c0_18] : memref<8x4xf32, #tpu.memory_space<vmem>>, vector<8x4xf32>
    tpu.vector_store %arg8[%c0_17, %c0_18], %22 {strides = array<i32>} : memref<8x4xf32, #tpu.memory_space<vmem>>, vector<8x4xf32>,
    return
  }
  func.func @transform_0(%arg0: i32) -> (i32, i32) {
    %c0_i32 = arith.constant 0 : i32
    %c0_i32_0 = arith.constant 0 : i32
    return %arg0, %c0_i32 : i32, i32
  }
  func.func @transform_1(%arg0: i32) -> (i32, i32) {
    %c0_i32 = arith.constant 0 : i32
    %c0_i32_0 = arith.constant 0 : i32
    %c0_i32_1 = arith.constant 0 : i32
    return %c0_i32, %c0_i32_0 : i32, i32
  }
  func.func @transform_2(%arg0: i32) -> (i32, i32) {
    %c0_i32 = arith.constant 0 : i32
    %c0_i32_0 = arith.constant 0 : i32
    %c0_i32_1 = arith.constant 0 : i32
    return %c0_i32, %c0_i32_0 : i32, i32
  }
  func.func @transform_3(%arg0: i32) -> (i32, i32) {
    %c0_i32 = arith.constant 0 : i32
    %c0_i32_0 = arith.constant 0 : i32
    %c0_i32_1 = arith.constant 0 : i32
    return %c0_i32, %c0_i32_0 : i32, i32
  }
  func.func @transform_4(%arg0: i32) -> (i32, i32) {
    %c0_i32 = arith.constant 0 : i32
    %c0_i32_0 = arith.constant 0 : i32
    %c0_i32_1 = arith.constant 0 : i32
    return %c0_i32, %c0_i32_0 : i32, i32
  }
  func.func @transform_5(%arg0: i32) -> (i32, i32) {
    %c0_i32 = arith.constant 0 : i32
    %c0_i32_0 = arith.constant 0 : i32
    %c0_i32_1 = arith.constant 0 : i32
    return %c0_i32, %c0_i32_0 : i32, i32
  }
  func.func @transform_6(%arg0: i32) -> (i32, i32) {
    %c0_i32 = arith.constant 0 : i32
    %c0_i32_0 = arith.constant 0 : i32
    %c0_i32_1 = arith.constant 0 : i32
    return %c0_i32, %c0_i32_0 : i32, i32
  }
  func.func @transform_7(%arg0: i32) -> (i32, i32) {
    %c0_i32 = arith.constant 0 : i32
    %c0_i32_0 = arith.constant 0 : i32
    return %arg0, %c0_i32 : i32, i32
  }
}

</mosaic_0001>

<bundles_post_ra>
// kernel: mlp_forward.1
= control target key start
LH: loop header
LB: loop body
LE: loop exit
PB: predicated region body
PF: predicated region fallthrough
CT: control target
= control target key end

     0   :  { %vm347_vm0 = vcmask 130048   ;;  %vm961_vm1 = vmmov 0   ;;  %vm725_vm2 = vcmask 31744   ;;  %s1248_s1 = inlined_call_operand.vmem [shape: bf16[400,256], index: 1, kind: input, shape index: {}]   ;;  %s1249_s0 = inlined_call_operand.vmem [shape: f32[8,400], index: 0, kind: input, shape index: {}]   ;;  %s1250_s3 = inlined_call_operand.vmem [shape: bf16[256,128], index: 3, kind: input, shape index: {}]   ;;  %s1251_s5 = inlined_call_operand.vmem [shape: bf16[128,4], index: 5, kind: input, shape index: {}]   ;;  %s1252_s2 = inlined_call_operand.vmem [shape: f32[1,256], index: 2, kind: input, shape index: {}]   ;;  %s1253_s4 = inlined_call_operand.vmem [shape: f32[1,128], index: 4, kind: input, shape index: {}]   ;;  %s1254_s6 = inlined_call_operand.vmem [shape: f32[1,4], index: 6, kind: input, shape index: {}]   ;;  %s1255_s7 = inlined_call_operand.vmem [shape: f32[8,4], index: 7, kind: output, shape index: {}]  }
   0x1   :  { %v861_v0 = vld [vmem:[%s1248_s1 + $0x74] ss:$8 sps:$4 sm:$0xff]   ;;  %v863_v1 = vld [vmem:[%s1248_s1 + $0x70] ss:$8 sps:$4 sm:$0xff]   ;;  %v864_v2 = vld [vmem:[%s1248_s1 + $0x64] ss:$8 sps:$4 sm:$0xff]  }
   0x2   :  { %351 = vmatprep.subr.bf16.mxu0 %v861_v0  ;;  %v866_v3 = vld [vmem:[%s1248_s1 + $0x60] ss:$8 sps:$4 sm:$0xff]   ;;  %v867_v4 = vld [vmem:[%s1248_s1 + $0x54] ss:$8 sps:$4 sm:$0xff]   ;;  %v869_v5 = vld [vmem:[%s1248_s1 + $0x50] ss:$8 sps:$4 sm:$0xff]  }
   0x3   :  { %352 = vmatpush1.bf16.msra.mxu0 %v863_v1  ;;  %v870_v6 = vld [vmem:[%s1248_s1 + $0x44] ss:$8 sps:$4 sm:$0xff]   ;;  %v881_v7 = vld [vmem:[%s1248_s1 + $0x174] ss:$8 sps:$4 sm:$0xff]   ;;  %v884_v8 = vld [vmem:[%s1248_s1 + $0x170] ss:$8 sps:$4 sm:$0xff]  }
   0x4   :  { %353 = vmatprep.subr.bf16.mxu0 %v864_v2  ;;  %v872_v9 = vld [vmem:[%s1248_s1 + $0x40] ss:$8 sps:$4 sm:$0xff]   ;;  %392 = vmatprep.subr.bf16.mxu1 %v881_v7  ;;  %v873_v10 = vld [vmem:[%s1248_s1 + $0x34] ss:$8 sps:$4 sm:$0xff]   ;;  %v887_v11 = vld [vmem:[%s1248_s1 + $0x164] ss:$8 sps:$4 sm:$0xff]  }
   0x5   :  { %393 = vmatpush1.bf16.msra.mxu1 %v884_v8  ;;  %v890_v12 = vld [vmem:[%s1248_s1 + $0x160] ss:$8 sps:$4 sm:$0xff]   ;;  %v875_v13 = vld [vmem:[%s1248_s1 + $0x30] ss:$8 sps:$4 sm:$0xff]   ;;  %v876_v14 = vld [vmem:[%s1248_s1 + $0x24] ss:$8 sps:$4 sm:$0xff]  }
   0x6   :  { %394 = vmatprep.subr.bf16.mxu1 %v887_v11  ;;  %v893_v15 = vld [vmem:[%s1248_s1 + $0x154] ss:$8 sps:$4 sm:$0xff]   ;;  %v896_v16 = vld [vmem:[%s1248_s1 + $0x150] ss:$8 sps:$4 sm:$0xff]   ;;  %v899_v17 = vld [vmem:[%s1248_s1 + $0x144] ss:$8 sps:$4 sm:$0xff]  }
   0x7   :  { %354 = vmatpush1.bf16.msra.mxu0 %v866_v3  ;;  %v878_v18 = vld [vmem:[%s1248_s1 + $0x20] ss:$8 sps:$4 sm:$0xff]   ;;  %v879_v19 = vld [vmem:[%s1248_s1 + $0x14] ss:$8 sps:$4 sm:$0xff]   ;;  %v883_v22 = vld [vmem:[%s1248_s1 + $0x10] ss:$8 sps:$4 sm:$0xff]  }
   0x8   :  { %355 = vmatprep.subr.bf16.mxu0 %v867_v4  ;;  %v902_v20 = vld [vmem:[%s1248_s1 + $0x140] ss:$8 sps:$4 sm:$0xff]   ;;  %v905_v21 = vld [vmem:[%s1248_s1 + $0x134] ss:$8 sps:$4 sm:$0xff]   ;;  %v885_v23 = vld [vmem:[%s1248_s1 + $0x4] ss:$8 sps:$4 sm:$0xff]  }
   0x9   :  { %395 = vmatpush1.bf16.msra.mxu1 %v890_v12  ;;  %v908_v24 = vld [vmem:[%s1248_s1 + $0x130] ss:$8 sps:$4 sm:$0xff]   ;;  %v911_v25 = vld [vmem:[%s1248_s1 + $0x124] ss:$8 sps:$4 sm:$0xff]   ;;  %v889_v26 = vld [vmem:[%s1248_s1] ss:$8 sps:$4 sm:$0xff]  }
   0xa   :  { %396 = vmatprep.subr.bf16.mxu1 %v893_v15  ;;  %v891_v27 = vld [vmem:[%s1248_s1 + $0xf4] ss:$8 sps:$4 sm:$0xff]   ;;  %v914_v28 = vld [vmem:[%s1248_s1 + $0x120] ss:$8 sps:$4 sm:$0xff]   ;;  %v895_v30 = vld [vmem:[%s1248_s1 + $0xf0] ss:$8 sps:$4 sm:$0xff]  }
   0xb   :  { %356 = vmatpush1.bf16.msra.mxu0 %v869_v5  ;;  %v917_v29 = vld [vmem:[%s1248_s1 + $0x114] ss:$8 sps:$4 sm:$0xff]   ;;  %v897_v31 = vld [vmem:[%s1248_s1 + $0xe4] ss:$8 sps:$4 sm:$0xff]   ;;  %v920_v32 = vld [vmem:[%s1248_s1 + $0x110] ss:$8 sps:$4 sm:$0xff]  }
   0xc   :  { %357 = vmatprep.subr.bf16.mxu0 %v870_v6  ;;  %v30_v33 = vld [vmem:[%s1249_s0 + $0x18] sm:$0xff]  ;;  %v923_v34 = vld [vmem:[%s1248_s1 + $0x104] ss:$8 sps:$4 sm:$0xff]   ;;  %v901_v36 = vld [vmem:[%s1248_s1 + $0xe0] ss:$8 sps:$4 sm:$0xff]  }
   0xd   :  { %397 = vmatpush1.bf16.msra.mxu1 %v896_v16  ;;  %v34_v35 = vpack.c.bf16 %v30_v33, %v30_v33  ;;  %v28_v37 = vld [vmem:[%s1249_s0 + $0x8] sm:$0xff]  ;;  %v903_v38 = vld [vmem:[%s1248_s1 + $0xd4] ss:$8 sps:$4 sm:$0xff]   ;;  %v907_v41 = vld [vmem:[%s1248_s1 + $0xd0] ss:$8 sps:$4 sm:$0xff]  }
   0xe   :  { %398 = vmatprep.subr.bf16.mxu1 %v899_v17  ;;  %v32_v39 = vpack.c.bf16 %v28_v37, %v28_v37  ;;  %v926_v40 = vld [vmem:[%s1248_s1 + $0x100] ss:$8 sps:$4 sm:$0xff]   ;;  %v929_v42 = vld [vmem:[%s1248_s1 + $0x184] ss:$8 sps:$4 sm:$0xff]   ;;  %v29_v45 = vld [vmem:[%s1249_s0 + $0x10] sm:$0xff] }
   0xf   :  { %358 = vmatpush1.bf16.msra.mxu0 %v872_v9  ;;  %781 = vmatprep.mubr.msk.bf16.mxu1 %vm347_vm0, %v34_v35  ;;  %v909_v43 = vld [vmem:[%s1248_s1 + $0xc4] ss:$8 sps:$4 sm:$0xff]   ;;  %v932_v44 = vld [vmem:[%s1248_s1 + $0x180] ss:$8 sps:$4 sm:$0xff]   ;;  %v936_v47 = vld [vmem:[%s1250_s3 + $0x78] sm:$0xff]   ;;  %v33_v50 = vpack.c.bf16 %v29_v45, %v29_v45 }
  0x10   :  { %359 = vmatprep.subr.bf16.mxu0 %v873_v10  ;;  %383 = vmatprep.mubr.bf16.mxu0 %v32_v39  ;;  %v913_v46 = vld [vmem:[%s1248_s1 + $0xc0] ss:$8 sps:$4 sm:$0xff]   ;;  %v915_v48 = vld [vmem:[%s1248_s1 + $0xb4] ss:$8 sps:$4 sm:$0xff]   ;;  %v919_v52 = vld [vmem:[%s1248_s1 + $0xb0] ss:$8 sps:$4 sm:$0xff]  }
  0x11   :  { %399 = vmatpush1.bf16.msra.mxu1 %v902_v20  ;;  %v937_v49 = vld [vmem:[%s1250_s3 + $0x38] sm:$0xff]   ;;  %v938_v51 = vld [vmem:[%s1250_s3 + $0x70] sm:$0xff]   ;;  %v921_v53 = vld [vmem:[%s1248_s1 + $0xa4] ss:$8 sps:$4 sm:$0xff]   ;;  %v960_v10 = vmov 0.0  }
  0x12   :  { %400 = vmatprep.subr.bf16.mxu1 %v905_v21  ;;  %v939_v54 = vld [vmem:[%s1250_s3 + $0x30] sm:$0xff]   ;;  %v940_v55 = vld [vmem:[%s1250_s3 + $0x68] sm:$0xff]   ;;  %v942_v59 = vld [vmem:[%s1250_s3 + $0x60] sm:$0xff]  }
  0x13   :  { %360 = vmatpush1.bf16.msra.mxu0 %v875_v13  ;;  %v925_v56 = vld [vmem:[%s1248_s1 + $0xa0] ss:$8 sps:$4 sm:$0xff]   ;;  %v927_v57 = vld [vmem:[%s1248_s1 + $0x94] ss:$8 sps:$4 sm:$0xff]   ;;  %v931_v60 = vld [vmem:[%s1248_s1 + $0x90] ss:$8 sps:$4 sm:$0xff]  }
  0x14   :  { %361 = vmatprep.subr.bf16.mxu0 %v876_v14  ;;  %v941_v58 = vld [vmem:[%s1250_s3 + $0x28] sm:$0xff]   ;;  %v943_v62 = vld [vmem:[%s1250_s3 + $0x20] sm:$0xff]   ;;  %v944_v2 = vld [vmem:[%s1250_s3 + $0x58] sm:$0xff]  }
  0x15   :  { %401 = vmatpush1.bf16.msra.mxu1 %v908_v24  ;;  %v933_v61 = vld [vmem:[%s1248_s1 + $0x84] ss:$8 sps:$4 sm:$0xff]   ;;  %v935_v63 = vld [vmem:[%s1248_s1 + $0x80] ss:$8 sps:$4 sm:$0xff]   ;;  %v945_v3 = vld [vmem:[%s1250_s3 + $0x18] sm:$0xff]  }
  0x16   :  { %402 = vmatprep.subr.bf16.mxu1 %v911_v25  ;;  %v27_v0 = vld [vmem:[%s1249_s0] sm:$0xff]  ;;  %v946_v4 = vld [vmem:[%s1250_s3 + $0x50] sm:$0xff]   ;;  %v948_v6 = vld [vmem:[%s1250_s3 + $0x48] sm:$0xff]  }
  0x17   :  { %362 = vmatpush1.bf16.msra.mxu0 %v878_v18  ;;  %v31_v1 = vpack.c.bf16 %v27_v0, %v27_v0  ;;  %v947_v5 = vld [vmem:[%s1250_s3 + $0x10] sm:$0xff]   ;;  %v949_v7 = vld [vmem:[%s1250_s3 + $0x8] sm:$0xff]   ;;  %v950_v8 = vld [vmem:[%s1250_s3 + $0x40] sm:$0xff]   ;;  %v87_v18 = vlaneseq }
  0x18   :  { %363 = vmatprep.subr.bf16.mxu0 %v879_v19  ;;  %v951_v9 = vld [vmem:[%s1250_s3] sm:$0xff]   ;;  %v952_v11 = vld [vmem:[%s1251_s5 + $0x38] sm:$0xff]   ;;  %v953_v12 = vld [vmem:[%s1251_s5 + $0x30] sm:$0xff]  }
  0x19   :  { %403 = vmatpush1.bf16.msra.mxu1 %v914_v28  ;;  %v954_v13 = vld [vmem:[%s1251_s5 + $0x28] sm:$0xff]   ;;  %v955_v14 = vld [vmem:[%s1251_s5 + $0x20] sm:$0xff]   ;;  %v956_v15 = vld [vmem:[%s1251_s5 + $0x18] sm:$0xff]   ;;  %v88_v21 = vshrl.u32 %v87_v18, 7 }
  0x1a   :  { %404 = vmatprep.subr.bf16.mxu1 %v917_v29  ;;  %v957_v39 = vld [vmem:[%s1251_s5 + $0x10] sm:$0xff]  }
  0x1b   :  { %364 = vmatpush1.bf16.msra.mxu0 %v883_v22  ;;  %v89_v22 = vsub.s32 0, %v88_v21  ;;  %v93_v24 = vsub.s32 1, %v88_v21 }
  0x1c   :  { %365 = vmatprep.subr.bf16.mxu0 %v885_v23  ;;  %v85_v23 = vld [vmem:[%s1252_s2] sm:$0x3] }
  0x1d   :  { %405 = vmatpush1.bf16.msra.mxu1 %v920_v32  ;;  %v90_v25 = vrot.slane %v85_v23, %v89_v22 }
  0x1e   :  { %406 = vmatprep.subr.bf16.mxu1 %v923_v34 }
  0x1f   :  { %366 = vmatpush1.bf16.msra.mxu0 %v889_v26  ;;  %v94_v26 = vrot.slane %v85_v23, %v93_v24 }
  0x20   :  { %367 = vmatprep.subr.bf16.mxu0 %v891_v27 }
  0x21   :  { %407 = vmatpush1.bf16.msra.mxu1 %v926_v40  ;;  %v958_v40 = vld [vmem:[%s1251_s5 + $0x8] sm:$0xff]  }
  0x22   :  { %422 = vmatprep.subr.bf16.mxu1 %v929_v42 }
  0x23   :  { %368 = vmatpush2.bf16.msra.mxu0 %v895_v30 }
  0x24   :  { %369 = vmatprep.subr.bf16.mxu0 %v897_v31 }
  0x25   :  { %423 = vmatpush2.bf16.msra.mxu1 %v932_v44 }
  0x26   :  { %808 = vmatprep.subr.bf16.mxu1 %v936_v47 }
  0x27   :  { %370 = vmatpush2.bf16.msra.mxu0 %v901_v36 }
  0x28   :  { %371 = vmatprep.subr.bf16.mxu0 %v903_v38  ;;  %425 = vmatmul.mubr.bf16.vlgmr.msra.gmra.mxu1 %v33_v50 }
  0x29   :  { %809 = vmatpush3.bf16.msra.mxu1 %v937_v49 }
  0x2a   :  { %810 = vmatprep.subr.bf16.mxu1 %v938_v51  ;;  %v799_v51 = vld [vmem:[%s1254_s6] ss:$0 sm:$0xff] }
  0x2b   :  { %372 = vmatpush2.bf16.msra.mxu0 %v907_v41  ;;  %v959_v41 = vld [vmem:[%s1251_s5] sm:$0xff]  }
  0x2c   :  { %373 = vmatprep.subr.bf16.mxu0 %v909_v43  ;;  %v782_v43 = vld [vmem:[%s1253_s4] ss:$0 sm:$0xff] }
  0x2d   :  { %811 = vmatpush3.bf16.msra.mxu1 %v939_v54 }
  0x2e   :  { %812 = vmatprep.subr.bf16.mxu1 %v940_v55 }
  0x2f   :  { %374 = vmatpush2.bf16.msra.mxu0 %v913_v46 }
  0x30   :  { %375 = vmatprep.subr.bf16.mxu0 %v915_v48 }
  0x31   :  { %813 = vmatpush3.bf16.msra.mxu1 %v941_v58 }
  0x32   :  { %814 = vmatprep.subr.bf16.mxu1 %v942_v59 }
  0x33   :  { %376 = vmatpush2.bf16.msra.mxu0 %v919_v52 }
  0x34   :  { %377 = vmatprep.subr.bf16.mxu0 %v921_v53 }
  0x35   :  { %815 = vmatpush3.bf16.msra.mxu1 %v943_v62 }
  0x36   :  { %816 = vmatprep.subr.bf16.mxu1 %v944_v2 }
  0x37   :  { %378 = vmatpush2.bf16.msra.mxu0 %v925_v56 }
  0x38   :  { %379 = vmatprep.subr.bf16.mxu0 %v927_v57 }
  0x39   :  { %817 = vmatpush3.bf16.msra.mxu1 %v945_v3 }
  0x3a   :  { %818 = vmatprep.subr.bf16.mxu1 %v946_v4 }
  0x3b   :  { %380 = vmatpush2.bf16.msra.mxu0 %v931_v60 }
  0x3c   :  { %381 = vmatprep.subr.bf16.mxu0 %v933_v61 }
  0x3d   :  { %819 = vmatpush3.bf16.msra.mxu1 %v947_v5 }
  0x3e   :  { %820 = vmatprep.subr.bf16.mxu1 %v948_v6 }
  0x3f   :  { %382 = vmatpush2.bf16.msra.mxu0 %v935_v63 }
  0x40   :  { %839 = vmatprep.subr.bf16.mxu0 %v960_v10 }
  0x41   :  { %821 = vmatpush3.bf16.msra.mxu1 %v949_v7 }
  0x42   :  { %384 = vmatmul.mubr.bf16.vlgmr.msra.gmra.mxu0 %v31_v1  ;;  %822 = vmatprep.subr.bf16.mxu1 %v950_v8 }
  0x43   :  { %840 = vmatpush3.bf16.msra.mxu0 %v952_v11  ;;  %855 = vmatprep.mubr.msk.bf16.mxu0 %vm961_vm1, %v960_v10 }
  0x44   :  { %841 = vmatprep.subr.bf16.mxu0 %v960_v10 }
  0x45   :  { %823 = vmatpush3.bf16.msra.mxu1 %v951_v9 }
  0x47   :  { %842 = vmatpush3.bf16.msra.mxu0 %v953_v12 }
  0x48   :  { %843 = vmatprep.subr.bf16.mxu0 %v960_v10 }
  0x4b   :  { %844 = vmatpush3.bf16.msra.mxu0 %v954_v13 }
  0x4c   :  { %845 = vmatprep.subr.bf16.mxu0 %v960_v10 }
  0x4f   :  { %846 = vmatpush3.bf16.msra.mxu0 %v955_v14 }
  0x50   :  { %847 = vmatprep.subr.bf16.mxu0 %v960_v10 }
  0x53   :  { %848 = vmatpush3.bf16.msra.mxu0 %v956_v15 }
  0x54   :  { %849 = vmatprep.subr.bf16.mxu0 %v960_v10 }
  0x57   :  { %850 = vmatpush3.bf16.msra.mxu0 %v957_v39 }
  0x58   :  { %851 = vmatprep.subr.bf16.mxu0 %v960_v10 }
  0x5b   :  { %852 = vmatpush3.bf16.msra.mxu0 %v958_v40 }
  0x5c   :  { %853 = vmatprep.subr.bf16.mxu0 %v960_v10 }
  0x5f   :  { %854 = vmatpush3.bf16.msra.mxu0 %v959_v41 }
  0xe8   :  { %v426_v16 = vpop.f32.mrf.mxu1 }
  0xea   :  { %v428_v17 = vpop.f32.mrf.mxu1 }
  0xec   :  { %v430_v19 = vpop.f32.mrf.mxu1 }
  0xee   :  { %v431_v20 = vpop.f32.mrf.mxu1 }
 0x102   :  { %v385_v27 = vpop.f32.mrf.mxu0 }
 0x103   :  { %v386_v28 = vadd.f32 %v385_v27, %v90_v25 }
 0x104   :  { %v387_v29 = vpop.f32.mrf.mxu0 }
 0x105   :  { %v427_v30 = vadd.f32 %v426_v16, %v386_v28  ;;  %v388_v31 = vadd.f32 %v387_v29, %v94_v26 }
 0x106   :  { %v389_v32 = vpop.f32.mrf.mxu0 }
 0x107   :  { %v429_v33 = vadd.f32 %v428_v17, %v388_v31  ;;  %v433_v34 = vmax.f32 %v427_v30, 0.0 }
 0x108   :  { %v390_v35 = vpop.f32.mrf.mxu0 }
 0x109   :  { %v434_v36 = vmax.f32 %v429_v33, 0.0  ;;  %v435_v38 = vpack.c.bf16 %v433_v34, %v433_v34 }
 0x10b   :  { %v436_v37 = vpack.c.bf16 %v434_v36, %v434_v36 }
 0x10d   :  { %604 = vmatprep.mubr.bf16.mxu1 %v436_v37 }
 0x10e   :  { %605 = vmatmul.mubr.bf16.vlgmr.msra.gmra.mxu1 %v435_v38 }
 0x1ce   :  { %v824_v42 = vpop.f32.mrf.mxu1 }
 0x1d0   :  { %v825_v44 = vpop.f32.mrf.mxu1 }
 0x1d1   :  { %v826_v45 = vadd.f32 %v825_v44, %v824_v42 }
 0x1d2   :  { %v827_v46 = vpop.f32.mrf.mxu1 }
 0x1d3   :  { %v607_v47 = vadd.f32 %v826_v45, %v782_v43 }
 0x1d4   :  { %v828_v48 = vpop.f32.mrf.mxu1 }
 0x1d5   :  { %v612_v49 = vmax.f32 %v607_v47, 0.0 }
 0x1d7   :  { %v613_v50 = vpack.c.bf16 %v612_v49, %v612_v49 }
 0x1d9   :  { %856 = vmatmul.mubr.bf16.vlgmr.msra.gmra.mxu0 %v613_v50 }
 0x299   :  { %v719_v52 = vpop.f32.mrf.mxu0 }
 0x29a   :  { %v720_v53 = vadd.f32 %v799_v51, %v719_v52 }
 0x29b   :  { %v857_v54 = vpop.f32.mrf.mxu0 }
 0x29c   :  { %726 = vst.msk [vmem:[%s1255_s7] sm:$0xff] %vm725_vm2, %v720_v53 }
 0x29d   :  { %v722_v55 = vpop.f32.mrf.mxu0 }
 0x29f   :  { %v858_v56 = vpop.f32.mrf.mxu0 }

</bundles_post_ra>
